<compile_context>
chip_gen: v7x
topology: tpu7x:2x2x1
jax: 0.10.0
libtpu: 0.0.40
codegen_flags: <defaults>
</compile_context>

<pallas_src>
import functools

import jax
import jax.numpy as jnp
from jax.experimental import pallas as pl
from jax.experimental.pallas import tpu as pltpu


def _round_up(x, m):
    return ((x + m - 1) // m) * m


def _min_grid_steps():
    """>=2 grid steps on v7x (2 TensorCores/chip) so the 'parallel' grid axis
    actually shards rows across both cores; 1 elsewhere (v5e/v6e: 1 TC)."""
    try:
        kind = jax.devices()[0].device_kind.lower()
    except Exception:
        return 1
    return 2 if ("v7" in kind or "7x" in kind) else 1


def _ppo_fused_kernel(x_ref, w1_ref, b1_ref, w2_ref, b2_ref, wh_ref, bh_ref,
                      out_ref, *, output_dim):
    """One batch-tile of the fused PPO forward.

    out_ref: (tile_rows, output_dim + 1) f32 (narrow, cheap HBM writeback):
      cols [0, output_dim) -> softmax(actor logits)
      col  output_dim      -> raw critic state value
    """
    hid_dt = w1_ref.dtype    # hidden-layer matmul input dtype (bf16 default)
    head_dt = wh_ref.dtype   # head matmul input dtype (f32 default: critic accuracy)

    x = x_ref[...]

    # shared layer 1: Linear + ReLU  (f32 accumulation, f32 bias/ReLU)
    h = jnp.dot(x.astype(hid_dt), w1_ref[...],
                preferred_element_type=jnp.float32) + b1_ref[...]
    h = jnp.maximum(h, 0.0)

    # shared layer 2: Linear + ReLU
    h = jnp.dot(h.astype(hid_dt), w2_ref[...],
                preferred_element_type=jnp.float32) + b2_ref[...]
    h = jnp.maximum(h, 0.0)

    # fused actor+critic head: ONE matmul over the lane-padded head width
    # (cols [0, output_dim) = actor logits, col output_dim = critic value).
    head = jnp.dot(h.astype(head_dt), wh_ref[...],
                   preferred_element_type=jnp.float32) + bh_ref[...]

    # Masked, numerically stable softmax over the first `output_dim` columns.
    # Mask BEFORE the exp so the critic column can never overflow to +inf.
    col = jax.lax.broadcasted_iota(jnp.int32, head.shape, 1)
    is_logit = col < output_dim
    logits = jnp.where(is_logit, head, jnp.float32(-1e30))
    m = jnp.max(logits, axis=-1, keepdims=True)
    e = jnp.exp(logits - m)                          # masked cols underflow to 0
    denom = jnp.sum(e, axis=-1, keepdims=True)
    probs = e * pl.reciprocal(denom, approx=False)   # exact: probs sum to 1

    # probs in logit columns, raw critic value in column `output_dim`; only the
    # narrow (output_dim + 1)-wide slab is stored to HBM.
    combined = jnp.where(is_logit, probs, head)
    out_cols = out_ref.shape[-1]
    out_ref[...] = combined[:, :out_cols].astype(out_ref.dtype)


def pack_params(p, weight_dtype=jnp.bfloat16, head_dtype=jnp.float32):
    """Fuse actor/critic heads and zero-pad hidden/head dims to 128 lanes.

    * weight_dtype (default bf16): hidden-layer weights. MXU-native on
      v5e/v6e/v7x; halves weight DMA and resident VMEM.
    * head_dtype (default f32): fused actor+critic head weights. Kept f32 so
      the critic value (and logits) keep full precision; the head matmul is
      tiny so this costs nothing.
    * input_dim is NOT padded (kernel is memory-bound, not MXU-bound).
    Call once; the returned dict is reused across forward calls.
    """
    input_dim = p["w1"].shape[0]
    hidden_dim = p["w1"].shape[1]
    output_dim = p["wa"].shape[1]
    hidden_pad = _round_up(hidden_dim, 128)
    head_pad = _round_up(output_dim + 1, 128)

    def pad2(a, rows, cols):
        return jnp.pad(a, ((0, rows - a.shape[0]), (0, cols - a.shape[1])))

    wh_raw = jnp.concatenate([p["wa"], p["wc"]], axis=1)   # (hidden, out+1)
    bh_raw = jnp.concatenate([p["ba"], p["bc"]], axis=1)   # (1, out+1)

    return dict(
        w1=pad2(p["w1"], input_dim, hidden_pad).astype(weight_dtype),
        b1=pad2(p["b1"], 1, hidden_pad).astype(jnp.float32),
        w2=pad2(p["w2"], hidden_pad, hidden_pad).astype(weight_dtype),
        b2=pad2(p["b2"], 1, hidden_pad).astype(jnp.float32),
        wh=pad2(wh_raw, hidden_pad, head_pad).astype(head_dtype),
        bh=pad2(bh_raw, 1, head_pad).astype(jnp.float32),
        input_dim=input_dim,
        output_dim=output_dim,
        hidden_pad=hidden_pad,
        head_pad=head_pad,
    )
    # TODO(synk): if hidden_dim ever grows to 1024-4096, re-derive the VMEM
    # budget (v7x has only 64 MiB) and add a hidden-dim grid axis if needed.


def ppo_forward(x, packed, *, block_rows=2048):
    """x: (B, input_dim), f32 (or bf16 straight from the producer).
    packed: output of pack_params(). Returns (action_probs, state_value)."""
    B, input_dim = x.shape
    assert input_dim == packed["input_dim"]
    output_dim = packed["output_dim"]
    hidden_pad = packed["hidden_pad"]
    head_pad = packed["head_pad"]
    out_cols = output_dim + 1

    # Number of row tiles: enough to cover B with <= block_rows rows/tile,
    # at least `min_steps` (v7x: keep both TensorCores busy), but never a
    # fully-padded tile. Tile rows are a multiple of 8 (sublane).
    n_steps = max(_min_grid_steps(), pl.cdiv(B, block_rows))
    n_steps = max(1, min(n_steps, pl.cdiv(B, 8)))
    tm = _round_up(pl.cdiv(B, n_steps), 8)
    B_pad = n_steps * tm
    if B_pad != B:
        x = jnp.pad(x, ((0, B_pad - B), (0, 0)))

    grid = (n_steps,)

    in_specs = [
        pl.BlockSpec((tm, input_dim), lambda i: (i, 0)),            # x tile
        pl.BlockSpec((input_dim, hidden_pad), lambda i: (0, 0)),    # W1 (resident)
        pl.BlockSpec((1, hidden_pad), lambda i: (0, 0)),            # b1
        pl.BlockSpec((hidden_pad, hidden_pad), lambda i: (0, 0)),   # W2
        pl.BlockSpec((1, hidden_pad), lambda i: (0, 0)),            # b2
        pl.BlockSpec((hidden_pad, head_pad), lambda i: (0, 0)),     # fused head W
        pl.BlockSpec((1, head_pad), lambda i: (0, 0)),              # fused head b
    ]
    # Narrow output (out_cols << 128): masked vst in VMEM (store slot has slack)
    # but ~14x less HBM writeback than a 128-wide f32 slab.
    out_specs = pl.BlockSpec((tm, out_cols), lambda i: (i, 0))
    out_shape = jax.ShapeDtypeStruct((B_pad, out_cols), jnp.float32)

    out = pl.pallas_call(
        functools.partial(_ppo_fused_kernel, output_dim=output_dim),
        grid=grid,
        in_specs=in_specs,
        out_specs=out_specs,
        out_shape=out_shape,
        compiler_params=pltpu.CompilerParams(
            dimension_semantics=("parallel",)),   # shard rows across TCs (v7x)
    )(x, packed["w1"], packed["b1"], packed["w2"], packed["b2"],
      packed["wh"], packed["bh"])

    probs = out[:B, :output_dim]
    value = out[:B, output_dim:out_cols]
    return probs, value


def init_params(key, input_dim, hidden_dim, output_dim):
    """Deterministic synthetic parameters (Kaiming-ish uniform like PyTorch).

    Weights stored as (in_features, out_features); biases as (1, out_features).
    """
    ks = jax.random.split(key, 8)

    def lin(kw, kb, fan_in, fan_out):
        bound = 1.0 / jnp.sqrt(fan_in)
        w = jax.random.uniform(kw, (fan_in, fan_out), jnp.float32, -bound, bound)
        b = jax.random.uniform(kb, (1, fan_out), jnp.float32, -bound, bound)
        return w, b

    w1, b1 = lin(ks[0], ks[1], input_dim, hidden_dim)
    w2, b2 = lin(ks[2], ks[3], hidden_dim, hidden_dim)
    wa, ba = lin(ks[4], ks[5], hidden_dim, output_dim)
    wc, bc = lin(ks[6], ks[7], hidden_dim, 1)
    return dict(w1=w1, b1=b1, w2=w2, b2=b2, wa=wa, ba=ba, wc=wc, bc=bc)


def reference_forward(x, p):
    hp = jax.lax.Precision.HIGHEST
    h = jnp.maximum(jnp.dot(x, p["w1"], precision=hp) + p["b1"], 0.0)
    h = jnp.maximum(jnp.dot(h, p["w2"], precision=hp) + p["b2"], 0.0)
    probs = jax.nn.softmax(jnp.dot(h, p["wa"], precision=hp) + p["ba"], axis=-1)
    value = jnp.dot(h, p["wc"], precision=hp) + p["bc"]
    return probs, value


if __name__ == "__main__":
    key = jax.random.PRNGKey(0)
    input_dim, hidden_dim, output_dim = 16, 32, 8

    kx, kp, kx2 = jax.random.split(key, 3)
    params = init_params(kp, input_dim, hidden_dim, output_dim)

    # --- default pack: bf16 hidden-layer weights, f32 head (v5e-friendly) ----
    packed_bf16 = pack_params(params)                     # bf16 hidden weights
    packed_f32 = pack_params(params, jnp.float32)         # all-f32 reference pack

    # small batch (typical unit-test scale for this module)
    x_small = jax.random.normal(kx, (8, input_dim), jnp.float32)
    probs, value = ppo_forward(x_small, packed_f32)
    jax.block_until_ready((probs, value))
    rp, rv = reference_forward(x_small, params)
    assert probs.shape == (8, output_dim)
    assert value.shape == (8, 1)
    assert jnp.allclose(probs, rp, atol=5e-3)
    assert jnp.allclose(value, rv, atol=2e-3, rtol=2e-3)
    assert jnp.allclose(jnp.sum(probs, axis=-1), 1.0, atol=1e-3)

    # large, non-multiple batch: exercises row tiling + padding + parallel grid
    x_big = jax.random.normal(kx2, (600, input_dim), jnp.float32)
    probs_b, value_b = ppo_forward(x_big, packed_f32)
    jax.block_until_ready((probs_b, value_b))
    rp_b, rv_b = reference_forward(x_big, params)
    assert probs_b.shape == (600, output_dim)
    assert value_b.shape == (600, 1)
    assert jnp.allclose(probs_b, rp_b, atol=5e-3)
    assert jnp.allclose(value_b, rv_b, atol=2e-3, rtol=2e-3)
    assert jnp.allclose(jnp.sum(probs_b, axis=-1), 1.0, atol=1e-3)

    # default bf16-weight path (hidden layers bf16, head f32): looser tolerance
    probs_h, value_h = ppo_forward(x_big, packed_bf16)
    jax.block_until_ready((probs_h, value_h))
    assert jnp.allclose(probs_h, rp_b, atol=5e-2)
    assert jnp.allclose(value_h, rv_b, atol=5e-2, rtol=5e-2)
    assert jnp.allclose(jnp.sum(probs_h, axis=-1), 1.0, atol=1e-3)

    print("KERNEL_OK")
</pallas_src>

<mosaic_0001>
module attributes {stable_mosaic.version = 11 : i64} {
  func.func @_ppo_fused_kernel(%arg0: i32, %arg1: memref<8x16xf32, #tpu.memory_space<vmem>>, %arg2: memref<16x128xf32, #tpu.memory_space<vmem>>, %arg3: memref<1x128xf32, #tpu.memory_space<vmem>>, %arg4: memref<128x128xf32, #tpu.memory_space<vmem>>, %arg5: memref<1x128xf32, #tpu.memory_space<vmem>>, %arg6: memref<128x128xf32, #tpu.memory_space<vmem>>, %arg7: memref<1x128xf32, #tpu.memory_space<vmem>>, %arg8: memref<8x9xf32, #tpu.memory_space<vmem>>) attributes {dimension_semantics = [#tpu.dimension_semantics<parallel>], iteration_bounds = array<i64: 1>, scalar_prefetch = 0 : i64, scratch_operands = 0 : i64, tpu.core_type = #tpu.core_type<tc>, window_params = [{transform_indices = @transform_0, window_bounds = array<i64: 8, 16>}, {pipeline_mode = #tpu.pipeline_mode<synchronous>, transform_indices = @transform_1, window_bounds = array<i64: 16, 128>}, {pipeline_mode = #tpu.pipeline_mode<synchronous>, transform_indices = @transform_2, window_bounds = array<i64: 1, 128>}, {pipeline_mode = #tpu.pipeline_mode<synchronous>, transform_indices = @transform_3, window_bounds = array<i64: 128, 128>}, {pipeline_mode = #tpu.pipeline_mode<synchronous>, transform_indices = @transform_4, window_bounds = array<i64: 1, 128>}, {pipeline_mode = #tpu.pipeline_mode<synchronous>, transform_indices = @transform_5, window_bounds = array<i64: 128, 128>}, {pipeline_mode = #tpu.pipeline_mode<synchronous>, transform_indices = @transform_6, window_bounds = array<i64: 1, 128>}, {transform_indices = @transform_7, window_bounds = array<i64: 8, 9>}]} {
    %c0 = arith.constant 0 : index
    %c0_0 = arith.constant 0 : index
    %0 = vector.load %arg1[%c0, %c0_0] : memref<8x16xf32, #tpu.memory_space<vmem>>, vector<8x16xf32>
    %c0_1 = arith.constant 0 : index
    %c0_2 = arith.constant 0 : index
    %1 = vector.load %arg2[%c0_1, %c0_2] : memref<16x128xf32, #tpu.memory_space<vmem>>, vector<16x128xf32>
    %cst = arith.constant dense<0.000000e+00> : vector<8x128xf32>
    %2 = tpu.matmul %0, %1, %cst {dimension_numbers = #tpu.dot_dimension_numbers<[1], [0], [0], [1], [0, 0, 1, 1], [], []>} : vector<8x16xf32>, vector<16x128xf32>, vector<8x128xf32> -> vector<8x128xf32>
    %c0_3 = arith.constant 0 : index
    %c0_4 = arith.constant 0 : index
    %3 = vector.load %arg3[%c0_3, %c0_4] : memref<1x128xf32, #tpu.memory_space<vmem>>, vector<1x128xf32>
    %4 = vector.broadcast %3 : vector<1x128xf32> to vector<8x128xf32>
    %5 = arith.addf %2, %4 : vector<8x128xf32>
    %cst_5 = arith.constant 0.000000e+00 : f32
    %6 = vector.broadcast %cst_5 : f32 to vector<8x128xf32>
    %7 = arith.maximumf %5, %6 : vector<8x128xf32>
    %c0_6 = arith.constant 0 : index
    %c0_7 = arith.constant 0 : index
    %8 = vector.load %arg4[%c0_6, %c0_7] : memref<128x128xf32, #tpu.memory_space<vmem>>, vector<128x128xf32>
    %cst_8 = arith.constant dense<0.000000e+00> : vector<8x128xf32>
    %9 = tpu.matmul %7, %8, %cst_8 {dimension_numbers = #tpu.dot_dimension_numbers<[1], [0], [0], [1], [0, 0, 1, 1], [], []>} : vector<8x128xf32>, vector<128x128xf32>, vector<8x128xf32> -> vector<8x128xf32>
    %c0_9 = arith.constant 0 : index
    %c0_10 = arith.constant 0 : index
    %10 = vector.load %arg5[%c0_9, %c0_10] : memref<1x128xf32, #tpu.memory_space<vmem>>, vector<1x128xf32>
    %11 = vector.broadcast %10 : vector<1x128xf32> to vector<8x128xf32>
    %12 = arith.addf %9, %11 : vector<8x128xf32>
    %cst_11 = arith.constant 0.000000e+00 : f32
    %13 = vector.broadcast %cst_11 : f32 to vector<8x128xf32>
    %14 = arith.maximumf %12, %13 : vector<8x128xf32>
    %c0_12 = arith.constant 0 : index
    %c0_13 = arith.constant 0 : index
    %15 = vector.load %arg6[%c0_12, %c0_13] : memref<128x128xf32, #tpu.memory_space<vmem>>, vector<128x128xf32>
    %cst_14 = arith.constant dense<0.000000e+00> : vector<8x128xf32>
    %16 = tpu.matmul %14, %15, %cst_14 {dimension_numbers = #tpu.dot_dimension_numbers<[1], [0], [0], [1], [0, 0, 1, 1], [], []>} : vector<8x128xf32>, vector<128x128xf32>, vector<8x128xf32> -> vector<8x128xf32>
    %c0_15 = arith.constant 0 : index
    %c0_16 = arith.constant 0 : index
    %17 = vector.load %arg7[%c0_15, %c0_16] : memref<1x128xf32, #tpu.memory_space<vmem>>, vector<1x128xf32>
    %18 = vector.broadcast %17 : vector<1x128xf32> to vector<8x128xf32>
    %19 = arith.addf %16, %18 : vector<8x128xf32>
    %20 = tpu.iota {dimensions = array<i32: 1>} : vector<8x128xi32>
    %c8_i32 = arith.constant 8 : i32
    %21 = vector.broadcast %c8_i32 : i32 to vector<8x128xi32>
    %22 = arith.cmpi slt, %20, %21 : vector<8x128xi32>
    %cst_17 = arith.constant -1.000000e+30 : f32
    %23 = vector.broadcast %cst_17 : f32 to vector<8x128xf32>
    %24 = arith.select %22, %19, %23 : vector<8x128xi1>, vector<8x128xf32>
    %cst_18 = arith.constant dense<0xFF800000> : vector<8xf32>
    %25 = vector.multi_reduction <maximumf>, %24, %cst_18 [1] : vector<8x128xf32> to vector<8xf32>
    %26 = vector.shape_cast %25 : vector<8xf32> to vector<8x1xf32>
    %27 = vector.broadcast %26 : vector<8x1xf32> to vector<8x128xf32>
    %28 = arith.subf %24, %27 : vector<8x128xf32>
    %29 = math.exp %28 : vector<8x128xf32>
    %cst_19 = arith.constant dense<0.000000e+00> : vector<8xf32>
    %30 = vector.multi_reduction <add>, %29, %cst_19 [1] : vector<8x128xf32> to vector<8xf32>
    %31 = vector.shape_cast %30 : vector<8xf32> to vector<8x1xf32>
    %32 = tpu.reciprocal %31 : vector<8x1xf32> -> vector<8x1xf32>
    %33 = vector.broadcast %32 : vector<8x1xf32> to vector<8x128xf32>
    %34 = arith.mulf %29, %33 : vector<8x128xf32>
    %35 = arith.select %22, %34, %19 : vector<8x128xi1>, vector<8x128xf32>
    %36 = vector.extract_strided_slice %35 {offsets = [0, 0], sizes = [8, 9], strides = [1, 1]} : vector<8x128xf32> to vector<8x9xf32>
    %c0_20 = arith.constant 0 : index
    %c0_21 = arith.constant 0 : index
    %37 = vector.load %arg8[%c0_20, %c0_21] : memref<8x9xf32, #tpu.memory_space<vmem>>, vector<8x9xf32>
    tpu.vector_store %arg8[%c0_20, %c0_21], %36 {strides = array<i32>} : memref<8x9xf32, #tpu.memory_space<vmem>>, vector<8x9xf32>,
    return
  }
  func.func @transform_0(%arg0: i32) -> (i32, i32) {
    %c0_i32 = arith.constant 0 : i32
    %c0_i32_0 = arith.constant 0 : i32
    return %arg0, %c0_i32 : i32, i32
  }
  func.func @transform_1(%arg0: i32) -> (i32, i32) {
    %c0_i32 = arith.constant 0 : i32
    %c0_i32_0 = arith.constant 0 : i32
    %c0_i32_1 = arith.constant 0 : i32
    return %c0_i32, %c0_i32_0 : i32, i32
  }
  func.func @transform_2(%arg0: i32) -> (i32, i32) {
    %c0_i32 = arith.constant 0 : i32
    %c0_i32_0 = arith.constant 0 : i32
    %c0_i32_1 = arith.constant 0 : i32
    return %c0_i32, %c0_i32_0 : i32, i32
  }
  func.func @transform_3(%arg0: i32) -> (i32, i32) {
    %c0_i32 = arith.constant 0 : i32
    %c0_i32_0 = arith.constant 0 : i32
    %c0_i32_1 = arith.constant 0 : i32
    return %c0_i32, %c0_i32_0 : i32, i32
  }
  func.func @transform_4(%arg0: i32) -> (i32, i32) {
    %c0_i32 = arith.constant 0 : i32
    %c0_i32_0 = arith.constant 0 : i32
    %c0_i32_1 = arith.constant 0 : i32
    return %c0_i32, %c0_i32_0 : i32, i32
  }
  func.func @transform_5(%arg0: i32) -> (i32, i32) {
    %c0_i32 = arith.constant 0 : i32
    %c0_i32_0 = arith.constant 0 : i32
    %c0_i32_1 = arith.constant 0 : i32
    return %c0_i32, %c0_i32_0 : i32, i32
  }
  func.func @transform_6(%arg0: i32) -> (i32, i32) {
    %c0_i32 = arith.constant 0 : i32
    %c0_i32_0 = arith.constant 0 : i32
    %c0_i32_1 = arith.constant 0 : i32
    return %c0_i32, %c0_i32_0 : i32, i32
  }
  func.func @transform_7(%arg0: i32) -> (i32, i32) {
    %c0_i32 = arith.constant 0 : i32
    %c0_i32_0 = arith.constant 0 : i32
    return %arg0, %c0_i32 : i32, i32
  }
}

</mosaic_0001>

<bundles_post_ra>
// kernel: tpu_custom_call.1
= control target key start
LH: loop header
LB: loop body
LE: loop exit
PB: predicated region body
PF: predicated region fallthrough
CT: control target
= control target key end

     0   :  { %12 = vsyncpa [#allocation3], 0  ;;  %s836_s0 = inlined_call_operand.hbm [shape: f32[8,16], index: 0, kind: input, shape index: {}]   ;;  %s837_s1 = inlined_call_operand.hbm [shape: f32[16,128], index: 1, kind: input, shape index: {}]   ;;  %s838_s2 = inlined_call_operand.vmem [shape: f32[1,128], index: 2, kind: input, shape index: {}]   ;;  %s839_s3 = inlined_call_operand.hbm [shape: f32[128,128], index: 3, kind: input, shape index: {}]   ;;  %s840_s4 = inlined_call_operand.vmem [shape: f32[1,128], index: 4, kind: input, shape index: {}]   ;;  %s841_s5 = inlined_call_operand.hbm [shape: f32[128,128], index: 5, kind: input, shape index: {}]   ;;  %s842_s6 = inlined_call_operand.vmem [shape: f32[1,128], index: 6, kind: input, shape index: {}]   ;;  %s843_s7 = inlined_call_operand.hbm [shape: f32[8,9], index: 7, kind: output, shape index: {}]  }
   0x1   :  { %13 = vsyncpa [#allocation6], 0 }
   0x2   :  { %14 = vsyncpa [#allocation9], 0 }
   0x3   :  { %15 = vsyncpa [#allocation4], 0  ;;  %s686_s24 = smov [#allocation5]   ;;  %s568_s28 = scalar_lea.hbm %s837_s1, 256 }
   0x4   :  { %s31_s25 = sshll.u32 %s686_s24, 4  ;;  %p569_p0 = scmp.ne.s32.totalorder %s837_s1, %s568_s28  ;;  %s32_s25 = int_to_ptr.vmem [resolvable:$true] %s31_s25 }
   0x5   :  { %p572_p1 = scmp.lt.u32.totalorder %s568_s28, %s837_s1 }
   0x7   :  { %p574_p2 = pnand %p572_p1, %p569_p0 }
   0x9   :  { %577 = shalt.err (!%p574_p2)
}
   0xa   :  { %s578_s10 = scalar_lea.vmem %s32_s25, 256  ;;  %p583_p4 = scmp.lt.s32.totalorder %s32_s25, %s32_s25 }
   0xb   :  { %p579_p3 = scmp.ne.s32.totalorder %s32_s25, %s578_s10  ;;  %p584_p5 = scmp.lt.s32.totalorder %s578_s10, %s578_s10 }
   0xd   :  { %p585_p6 = por %p584_p5, %p583_p4 }
   0xf   :  { %p586_p7 = pnand %p585_p6, %p579_p3 }
  0x11   :  { %589 = shalt.err (!%p586_p7)
}
  0x12   :  { %s687_s11 = smov 128   ;;  %s688_s12 = smov 8  }
  0x13   :  { %37 = dma.hbm_to_vmem [thread:$0]  %s837_s1, 256, %s32_s25, [#allocation6], %s687_s11, %s687_s11, %s688_s12  }
  0x14   :  { %s689_s15 = smov [#allocation2]   ;;  %s690_s17 = smov [#allocation7]  }
  0x15   :  { %s22_s16 = sshll.u32 %s689_s15, 4  ;;  %s45_s18 = sshll.u32 %s690_s17, 4  ;;  %s23_s16 = int_to_ptr.vmem [resolvable:$true] %s22_s16  ;;  %s46_s18 = int_to_ptr.vmem [resolvable:$true] %s45_s18 }
  0x16   :  { %s590_s21 = scalar_lea.hbm %s836_s0, 128 }
  0x17   :  { %p591_p8 = scmp.ne.s32.totalorder %s836_s0, %s590_s21  ;;  %p594_p9 = scmp.lt.u32.totalorder %s590_s21, %s836_s0 }
  0x19   :  { %p596_p10 = pnand %p594_p9, %p591_p8 }
  0x1b   :  { %599 = shalt.err (!%p596_p10)
}
  0x1c   :  { %s600_s1 = scalar_lea.vmem %s23_s16, 128  ;;  %p605_p12 = scmp.lt.s32.totalorder %s23_s16, %s23_s16 }
  0x1d   :  { %p601_p11 = scmp.ne.s32.totalorder %s23_s16, %s600_s1  ;;  %p606_p13 = scmp.lt.s32.totalorder %s600_s1, %s600_s1 }
  0x1f   :  { %p607_p0 = por %p606_p13, %p605_p12 }
  0x21   :  { %p608_p1 = pnand %p607_p0, %p601_p11 }
  0x23   :  { %611 = shalt.err (!%p608_p1)
}
  0x24   :  { %25 = dma.hbm_to_vmem [thread:$0]  %s836_s0, 128, %s23_s16, [#allocation3]  }
  0x25   :  { %s612_s30 = scalar_lea.hbm %s839_s3, 2048 }
  0x26   :  { %p613_p2 = scmp.ne.s32.totalorder %s839_s3, %s612_s30  ;;  %p616_p3 = scmp.lt.u32.totalorder %s612_s30, %s839_s3 }
  0x28   :  { %p618_p4 = pnand %p616_p3, %p613_p2 }
  0x2a   :  { %621 = shalt.err (!%p618_p4)
}
  0x2b   :  { %s622_s14 = scalar_lea.vmem %s46_s18, 2048  ;;  %p627_p6 = scmp.lt.s32.totalorder %s46_s18, %s46_s18 }
  0x2c   :  { %p623_p5 = scmp.ne.s32.totalorder %s46_s18, %s622_s14  ;;  %p628_p7 = scmp.lt.s32.totalorder %s622_s14, %s622_s14 }
  0x2e   :  { %p629_p8 = por %p628_p7, %p627_p6 }
  0x30   :  { %p630_p9 = pnand %p629_p8, %p623_p5 }
  0x32   :  { %633 = shalt.err (!%p630_p9)
}
  0x33   :  { %51 = dma.hbm_to_vmem [thread:$0]  %s839_s3, 2048, %s46_s18, [#allocation6], %s687_s11, %s687_s11, %s688_s12  }
  0x34   :  { %s691_s16 = smov [#allocation8]   ;;  %s634_s21 = scalar_lea.hbm %s841_s5, 2048 }
  0x35   :  { %s59_s17 = sshll.u32 %s691_s16, 4  ;;  %p635_p10 = scmp.ne.s32.totalorder %s841_s5, %s634_s21  ;;  %s60_s17 = int_to_ptr.vmem [resolvable:$true] %s59_s17 }
  0x36   :  { %p638_p11 = scmp.lt.u32.totalorder %s634_s21, %s841_s5 }
  0x38   :  { %p640_p12 = pnand %p638_p11, %p635_p10 }
  0x3a   :  { %643 = shalt.err (!%p640_p12)
}
  0x3b   :  { %s644_s1 = scalar_lea.vmem %s60_s17, 2048  ;;  %p649_p0 = scmp.lt.s32.totalorder %s60_s17, %s60_s17 }
  0x3c   :  { %p645_p13 = scmp.ne.s32.totalorder %s60_s17, %s644_s1  ;;  %p650_p1 = scmp.lt.s32.totalorder %s644_s1, %s644_s1 }
  0x3e   :  { %p651_p2 = por %p650_p1, %p649_p0 }
  0x40   :  { %p652_p3 = pnand %p651_p2, %p645_p13 }
  0x42   :  { %655 = shalt.err (!%p652_p3)
}
  0x43   :  { %65 = dma.hbm_to_vmem [thread:$0]  %s841_s5, 2048, %s60_s17, [#allocation9], %s687_s11, %s687_s11, %s688_s12  }
  0x44   :  { %678 = dma.done.wait [#allocation3], 128  }
  0x45   :  { %679 = vsyncadd [#allocation3], 4294967168 }
  0x46   :  { %680 = dma.done.wait [#allocation6], 2304  }
  0x47   :  { %681 = vsyncadd [#allocation6], 4294964992 }
  0x48   :  { %682 = dma.done.wait [#allocation9], 2048  }
  0x49   :  { %683 = vsyncadd [#allocation9], 4294965248  ;;  %v692_v0 = vmov 0.0|0.0   ;;  %vm693_vm0 = vmmov 0   ;;  %v694_v1 = vmov 0.0   ;;  %v81_v2 = vld [vmem:[#allocation5] sm:$0xff] }
  0x4a   :  { %503 = vmatprep.subr.bf16.mxu0 %v692_v0  ;;  %430 = vmatprep.mubr.msk.f32.mxu0 %vm693_vm0, %v694_v1  ;;  %v82_v3 = vld [vmem:[#allocation5 + $0x8] sm:$0xff]  ;;  %v165_v5 = vld [vmem:[#allocation7] sm:$0xff]  ;;  %v166_v6 = vld [vmem:[#allocation7 + $0x8] sm:$0xff]  ;;  %vm90_vm1 = vcmask 130048   ;;  %vm366_vm3 = vcmask 72704  }
  0x4b   :  { %506 = vmatprep.subr.bf16.mxu1 %v692_v0  ;;  %465 = vmatprep.mubr.msk.f32.mxu1 %vm693_vm0, %v694_v1  ;;  %v504_v4 = vpack.c.bf16 %v82_v3, %v81_v2  ;;  %v167_v7 = vld [vmem:[#allocation7 + $0x10] sm:$0xff]  ;;  %v507_v8 = vpack.c.bf16 %v166_v6, %v165_v5  ;;  %v168_v9 = vld [vmem:[#allocation7 + $0x18] sm:$0xff]  ;;  %v80_v10 = vld [vmem:[#allocation2] sm:$0xff] }
  0x4c   :  { %v510_v11 = vpack.c.bf16 %v168_v9, %v167_v7  ;;  %v169_v12 = vld [vmem:[#allocation7 + $0x20] sm:$0xff]  ;;  %v170_v13 = vld [vmem:[#allocation7 + $0x28] sm:$0xff]  ;;  %v171_v15 = vld [vmem:[#allocation7 + $0x30] sm:$0xff] }
  0x4d   :  { %505 = vmatpush3.bf16.msra.mxu0 %v504_v4  ;;  %508 = vmatpush3.bf16.msra.mxu1 %v507_v8  ;;  %v513_v14 = vpack.c.bf16 %v170_v13, %v169_v12  ;;  %v172_v16 = vld [vmem:[#allocation7 + $0x38] sm:$0xff]  ;;  %v173_v18 = vld [vmem:[#allocation7 + $0x40] sm:$0xff]  ;;  %v174_v19 = vld [vmem:[#allocation7 + $0x48] sm:$0xff] }
  0x4e   :  { %530 = vmatprep.subr.bf16.mxu0 %v692_v0  ;;  %509 = vmatprep.subr.bf16.mxu1 %v692_v0  ;;  %v516_v17 = vpack.c.bf16 %v172_v16, %v171_v15  ;;  %v519_v20 = vpack.c.bf16 %v174_v19, %v173_v18  ;;  %v175_v21 = vld [vmem:[#allocation7 + $0x50] sm:$0xff]  ;;  %v176_v22 = vld [vmem:[#allocation7 + $0x58] sm:$0xff]  ;;  %v177_v24 = vld [vmem:[#allocation7 + $0x60] sm:$0xff] }
  0x4f   :  { %v522_v23 = vpack.c.bf16 %v176_v22, %v175_v21  ;;  %v178_v25 = vld [vmem:[#allocation7 + $0x68] sm:$0xff]  ;;  %v179_v27 = vld [vmem:[#allocation7 + $0x70] sm:$0xff]  ;;  %v180_v28 = vld [vmem:[#allocation7 + $0x78] sm:$0xff] }
  0x50   :  { %431 = vmatmul.mubr.msk.f32.vlgmr.msra.gmra.mrb[0].mxu0 %vm90_vm1, %v80_v10  ;;  %v525_v26 = vpack.c.bf16 %v178_v25, %v177_v24  ;;  %v528_v29 = vpack.c.bf16 %v180_v28, %v179_v27  ;;  %v259_v30 = vld [vmem:[#allocation8] sm:$0xff]  ;;  %v260_v31 = vld [vmem:[#allocation8 + $0x8] sm:$0xff]  ;;  %v261_v32 = vld [vmem:[#allocation8 + $0x10] sm:$0xff] }
  0x51   :  { %500 = vmatprep.mubr.msk.f32.mxu0 %vm693_vm0, %v694_v1  ;;  %511 = vmatpush3.bf16.msra.mxu1 %v510_v11  ;;  %v531_v33 = vpack.c.bf16 %v260_v31, %v259_v30  ;;  %v262_v34 = vld [vmem:[#allocation8 + $0x18] sm:$0xff]  ;;  %v263_v36 = vld [vmem:[#allocation8 + $0x20] sm:$0xff]  ;;  %v264_v37 = vld [vmem:[#allocation8 + $0x28] sm:$0xff] }
  0x52   :  { %512 = vmatprep.subr.bf16.mxu1 %v692_v0  ;;  %v534_v35 = vpack.c.bf16 %v262_v34, %v261_v32  ;;  %v537_v38 = vpack.c.bf16 %v264_v37, %v263_v36  ;;  %v265_v39 = vld [vmem:[#allocation8 + $0x30] sm:$0xff]  ;;  %v266_v40 = vld [vmem:[#allocation8 + $0x38] sm:$0xff]  ;;  %v267_v42 = vld [vmem:[#allocation8 + $0x40] sm:$0xff] }
  0x53   :  { %532 = vmatpush3.bf16.msra.mxu0 %v531_v33  ;;  %v540_v41 = vpack.c.bf16 %v266_v40, %v265_v39  ;;  %v268_v43 = vld [vmem:[#allocation8 + $0x48] sm:$0xff]  ;;  %v269_v45 = vld [vmem:[#allocation8 + $0x50] sm:$0xff]  ;;  %v270_v46 = vld [vmem:[#allocation8 + $0x58] sm:$0xff] }
  0x54   :  { %533 = vmatprep.subr.bf16.mxu0 %v692_v0  ;;  %v543_v44 = vpack.c.bf16 %v268_v43, %v267_v42  ;;  %v546_v47 = vpack.c.bf16 %v270_v46, %v269_v45  ;;  %v271_v48 = vld [vmem:[#allocation8 + $0x60] sm:$0xff]  ;;  %v272_v49 = vld [vmem:[#allocation8 + $0x68] sm:$0xff]  ;;  %v273_v56 = vld [vmem:[#allocation8 + $0x70] sm:$0xff] }
  0x55   :  { %514 = vmatpush3.bf16.msra.mxu1 %v513_v14  ;;  %v549_v50 = vpack.c.bf16 %v272_v49, %v271_v48  ;;  %v385_v51 = vld [vmem:[%s838_s2] ss:$0 sm:$0xff]  ;;  %v274_v57 = vld [vmem:[#allocation8 + $0x78] sm:$0xff] }
  0x56   :  { %515 = vmatprep.subr.bf16.mxu1 %v692_v0  ;;  %v552_v58 = vpack.c.bf16 %v274_v57, %v273_v56  ;;  %v387_v59 = vld [vmem:[%s840_s4] ss:$0 sm:$0xff]  ;;  %s695_s4 = smov [#allocation10]  }
  0x57   :  { %535 = vmatpush3.bf16.msra.mxu0 %v534_v35  ;;  %v388_v2 = vld [vmem:[%s842_s6] ss:$0 sm:$0xff]  ;;  %s374_s28 = sshll.u32 %s695_s4, 4  ;;  %s375_s28 = int_to_ptr.vmem [resolvable:$true] %s374_s28 }
  0x58   :  { %536 = vmatprep.subr.bf16.mxu0 %v692_v0  ;;  %s656_s6 = scalar_lea.vmem %s375_s28, 128  ;;  %p661_p5 = scmp.lt.s32.totalorder %s375_s28, %s375_s28 }
  0x59   :  { %517 = vmatpush3.bf16.msra.mxu1 %v516_v17  ;;  %p657_p4 = scmp.ne.s32.totalorder %s375_s28, %s656_s6  ;;  %p662_p6 = scmp.lt.s32.totalorder %s656_s6, %s656_s6 }
  0x5a   :  { %518 = vmatprep.subr.bf16.mxu1 %v692_v0 }
  0x5b   :  { %538 = vmatpush3.bf16.msra.mxu0 %v537_v38  ;;  %p663_p7 = por %p662_p6, %p661_p5 }
  0x5c   :  { %539 = vmatprep.subr.bf16.mxu0 %v692_v0 }
  0x5d   :  { %520 = vmatpush3.bf16.msra.mxu1 %v519_v20  ;;  %p664_p8 = pnand %p663_p7, %p657_p4 }
  0x5e   :  { %521 = vmatprep.subr.bf16.mxu1 %v692_v0 }
  0x5f   :  { %541 = vmatpush3.bf16.msra.mxu0 %v540_v41 }
  0x60   :  { %542 = vmatprep.subr.bf16.mxu0 %v692_v0 }
  0x61   :  { %523 = vmatpush3.bf16.msra.mxu1 %v522_v23 }
  0x62   :  { %524 = vmatprep.subr.bf16.mxu1 %v692_v0 }
  0x63   :  { %544 = vmatpush3.bf16.msra.mxu0 %v543_v44 }
  0x64   :  { %545 = vmatprep.subr.bf16.mxu0 %v692_v0 }
  0x65   :  { %526 = vmatpush3.bf16.msra.mxu1 %v525_v26 }
  0x66   :  { %527 = vmatprep.subr.bf16.mxu1 %v692_v0 }
  0x67   :  { %547 = vmatpush3.bf16.msra.mxu0 %v546_v47 }
  0x68   :  { %548 = vmatprep.subr.bf16.mxu0 %v692_v0 }
  0x69   :  { %529 = vmatpush3.bf16.msra.mxu1 %v528_v29 }
  0x6b   :  { %550 = vmatpush3.bf16.msra.mxu0 %v549_v50 }
  0x6c   :  { %551 = vmatprep.subr.bf16.mxu0 %v692_v0  ;;  %v352_v0 = vlaneseq }
  0x6e   :  { %v353_v1 = vand.u32 127, %v352_v0 }
  0x6f   :  { %553 = vmatpush3.bf16.msra.mxu0 %v552_v58 }
  0x70   :  { %vm354_vm2 = vcmp.lt.s32.totalorder %v353_v1, 8 }
 0x123   :  { %v160_v52 = vpop.f32.mrb[0].mxu0 }
 0x124   :  { %v161_v53 = vadd.f32 %v385_v51, %v160_v52  ;;  %v432_v54 = vpop.f32.mrb[1].mxu0 }
 0x126   :  { %v164_v55 = vmax.f32 %v161_v53, 0.0 }
 0x128   :  { %466 = vmatmul.mubr.f32.vlgmr.msra.gmra.mrb[0].mxu1 %v164_v55 }
 0x1fb   :  { %v254_v60 = vpop.f32.mrb[0].mxu1 }
 0x1fc   :  { %v255_v61 = vadd.f32 %v387_v59, %v254_v60  ;;  %v467_v62 = vpop.f32.mrb[1].mxu1 }
 0x1fe   :  { %v258_v63 = vmax.f32 %v255_v61, 0.0 }
 0x200   :  { %501 = vmatmul.mubr.f32.vlgmr.msra.gmra.mrb[2].mxu0 %v258_v63 }
 0x2d3   :  { %v348_v3 = vpop.f32.mrb[2].mxu0 }
 0x2d4   :  { %v349_v4 = vadd.f32 %v388_v2, %v348_v3  ;;  %v502_v5 = vpop.f32.mrb[3].mxu0 }
 0x2d6   :  { %v355_v6 = vsel %vm354_vm2, %v349_v4, -1e+30 }
 0x2d7   :  { %356 = vmax.xlane.f32.xlu0 %v355_v6 }
 0x364   :  { %v357_v7 = vpop.xlane.xlu0 %356 }
 0x365   :  { %v358_v8 = vsub.f32 %v355_v6, %v357_v7 }
 0x367   :  { %v359_v9 = vmul.f32 1.442695, %v358_v8 }
 0x369   :  { %564 = vpow2.f32 %v359_v9 }
 0x373   :  { %v565_v10 = vpop.eup %564 }
 0x374   :  { %361 = vadd.xlane.f32.xlu0 %v565_v10 }
 0x401   :  { %v362_v11 = vpop.xlane.xlu0 %361 }
 0x402   :  { %566 = vrcp.f32 %v362_v11 }
 0x40c   :  { %v567_v12 = vpop.eup %566 }
 0x40d   :  { %v364_v13 = vmul.f32 %v567_v12, %v565_v10 }
 0x40f   :  { %v365_v14 = vsel %vm354_vm2, %v364_v13, %v349_v4 }
 0x410   :  { %367 = vst.msk [vmem:[#allocation10] sm:$0xff] %vm366_vm3, %v365_v14 }
 0x411   :  { %667 = shalt.err (!%p664_p8)
}
 0x412   :  { %s668_s8 = scalar_lea.hbm %s843_s7, 128 }
 0x413   :  { %p669_p9 = scmp.ne.s32.totalorder %s843_s7, %s668_s8  ;;  %p672_p10 = scmp.lt.u32.totalorder %s668_s8, %s843_s7 }
 0x415   :  { %p674_p11 = pnand %p672_p10, %p669_p9 }
 0x417   :  { %677 = shalt.err (!%p674_p11)
}
 0x418   :  { %377 = dma.vmem_to_hbm [thread:$0]  %s375_s28, 128, %s843_s7, [#allocation4]  }
 0x419   :  { %684 = dma.done.wait [#allocation4], 128  }
 0x41a   :  { %685 = vsyncadd [#allocation4], 4294967168 }
 0x41b   :  { %381 = vsyncpa [#allocation3], 1 }
 0x41c   :  { %382 = vsyncpa [#allocation6], 1 }
 0x41d   :  { %383 = vsyncpa [#allocation9], 1 }
 0x41e   :  { %384 = vsyncpa [#allocation4], 1 }

</bundles_post_ra>
